<compile_context>
chip_gen: v5e
topology: v5e:2x2
jax: 0.10.0
libtpu: 0.0.40
codegen_flags: <defaults>
</compile_context>

<pallas_src>
import functools
import math

import jax
import jax.numpy as jnp
from jax.experimental import pallas as pl
from jax.experimental.pallas import tpu as pltpu


def _round_up(v, m):
    return ((v + m - 1) // m) * m


def _pick_tiles(n):
    # tm multiple of 32 (int8 sublane packing), tn multiple of 128 (lane dense).
    if n >= 4096:
        return 512, 2048
    if n >= 1024:
        return 256, 1024
    if n >= 256:
        return 128, 256
    return 32, 128


def prelude_kernel(x_ref, w_ref, b_ref, a_src_ref, a_dst_ref,
                   emb_ref, s_src_ref, s_dst_ref):
    """Linear layer + per-node halves of the attention logit (f32 math)."""
    emb = jnp.dot(x_ref[...], w_ref[...],
                  preferred_element_type=jnp.float32) + b_ref[...]
    emb_ref[...] = emb.astype(emb_ref.dtype)          # stored bf16 for MXU/HBM
    # s_src: VPU multiply + lane reduce, kept sublane-major (tp, 1).
    s_src_ref[...] = jnp.sum(emb * a_src_ref[...], axis=1, keepdims=True)
    # s_dst: contract on emb's feature axis so the result lands lane-major
    # as (1, tp) -- avoids any per-tile transpose in the main loop.
    s_dst_ref[...] = jax.lax.dot_general(
        a_dst_ref[...], emb, (((1,), (1,)), ((), ())),
        preferred_element_type=jnp.float32)


def aggregate_kernel(cols_ref, nnz_ref, s_src_ref, s_dst_ref, adj_ref, emb_ref,
                     out_ref, acc_ref, rsum_ref, *,
                     slope_ratio, max_nnz, tn, emb_resident):
    i = pl.program_id(0)
    j = pl.program_id(1)

    @pl.when(j == 0)
    def _init():
        acc_ref[...] = jnp.zeros_like(acc_ref)
        rsum_ref[...] = jnp.zeros_like(rsum_ref)

    # Compacted column-block walk: steps past this row tile's nonzero count are
    # pure padding (their index maps repeat the last valid block, so no new
    # DMA was issued for them either).
    @pl.when(j < nnz_ref[i])
    def _accumulate():
        z = s_src_ref[...] + s_dst_ref[...]           # (tm,1)+(1,tn) -> (tm,tn)
        lrelu = jnp.maximum(z, slope_ratio * z)       # leaky-relu, 0<slope<1
        scores = jnp.exp(lrelu) * adj_ref[...].astype(jnp.float32)
        rsum_ref[...] += jnp.sum(scores, axis=1, keepdims=True)
        if emb_resident:
            c = cols_ref[i * max_nnz + j]
            row0 = pl.multiple_of(c * tn, tn)
            emb_blk = emb_ref[pl.ds(row0, tn), :]     # slice resident bf16 slab
        else:
            emb_blk = emb_ref[...]                    # streamed (tn, Dp) block
        # bf16 x bf16 MXU matmul, f32 accumulation (flash-attention style).
        acc_ref[...] += jnp.dot(scores.astype(jnp.bfloat16), emb_blk,
                                preferred_element_type=jnp.float32)

    @pl.when(j == pl.num_programs(1) - 1)
    def _finalize():
        inv = pl.reciprocal(rsum_ref[...] + 1e-12, approx=True)
        out_ref[...] = acc_ref[...] * inv


def attention_aggregator(x, edge_index, w_t, b, a, slope_ratio=0.1):
    """x: (N, in_dim) f32; edge_index: (2, E) i32; w_t: (in_dim, out_dim);
    b: (out_dim,); a: (2*out_dim, 1)."""
    N, in_dim = x.shape
    out_dim = w_t.shape[1]
    f32 = jnp.float32

    tm, tn = _pick_tiles(N)
    lcm = (tm * tn) // math.gcd(tm, tn)
    Np = _round_up(N, lcm)                  # padded node count
    Dp = _round_up(out_dim, 128)            # lane-padded feature width
    n_rt, n_ct = Np // tm, Np // tn
    tp = 512 if Np % 512 == 0 else (256 if Np % 256 == 0 else 128)

    # Zero-padded operands (padded rows/cols contribute nothing: adj is zero
    # there, and padded feature columns of W / b / a are zero).
    x_p = jnp.zeros((Np, in_dim), f32).at[:N].set(x.astype(f32))
    w_p = jnp.zeros((in_dim, Dp), f32).at[:, :out_dim].set(w_t.astype(f32))
    b_p = jnp.zeros((1, Dp), f32).at[0, :out_dim].set(b.astype(f32))
    a_src = jnp.zeros((1, Dp), f32).at[0, :out_dim].set(a[:out_dim, 0].astype(f32))
    a_dst = jnp.zeros((1, Dp), f32).at[0, :out_dim].set(a[out_dim:, 0].astype(f32))

    src = edge_index[0].astype(jnp.int32)
    dst = edge_index[1].astype(jnp.int32)

    # Dense edge-multiplicity matrix built directly as int8 (no 4*Np^2 int32
    # intermediate).  Assumes per-(src,dst) multiplicity <= 127.
    adj = jnp.zeros((Np, Np), jnp.int8).at[src, dst].add(jnp.int8(1))

    # Per-(row-tile, col-tile) occupancy -> compacted nonzero column-block list
    # per row tile.  1-D int32 SMEM tables (no 2-D SMEM padding blowup); padded
    # entries repeat the last valid block id so padded grid steps reuse the
    # already-fetched block (no DMA).
    counts2d = jnp.zeros((n_rt, n_ct), jnp.int32).at[src // tm, dst // tn].add(1)
    occupied = counts2d > 0
    nnz = jnp.sum(occupied, axis=1).astype(jnp.int32)            # (n_rt,)
    jidx = jnp.arange(n_ct, dtype=jnp.int32)[None, :]
    sort_key = jnp.where(occupied, jidx, jidx + n_ct)
    order = jnp.argsort(sort_key, axis=1).astype(jnp.int32)      # nonzero first
    last = jnp.maximum(nnz - 1, 0)[:, None]
    cols_padded = jnp.where(jidx < nnz[:, None], order,
                            jnp.take_along_axis(order, last, axis=1))
    max_nnz = max(int(jnp.max(nnz)), 1)                          # host-side
    cols = cols_padded[:, :max_nnz].reshape(-1).astype(jnp.int32)

    # Phase 1: linear layer + per-node attention-logit halves (row-tiled).
    emb, s_src, s_dst = pl.pallas_call(
        prelude_kernel,
        out_shape=(jax.ShapeDtypeStruct((Np, Dp), jnp.bfloat16),
                   jax.ShapeDtypeStruct((Np, 1), f32),
                   jax.ShapeDtypeStruct((1, Np), f32)),
        grid=(Np // tp,),
        in_specs=[
            pl.BlockSpec((tp, in_dim), lambda i: (i, 0)),
            pl.BlockSpec((in_dim, Dp), lambda i: (0, 0)),
            pl.BlockSpec((1, Dp), lambda i: (0, 0)),
            pl.BlockSpec((1, Dp), lambda i: (0, 0)),
            pl.BlockSpec((1, Dp), lambda i: (0, 0)),
        ],
        out_specs=(
            pl.BlockSpec((tp, Dp), lambda i: (i, 0)),
            pl.BlockSpec((tp, 1), lambda i: (i, 0)),
            pl.BlockSpec((1, tp), lambda i: (0, i)),
        ),
        compiler_params=pltpu.CompilerParams(
            dimension_semantics=("parallel",),
            vmem_limit_bytes=48 * 1024 * 1024),
    )(x_p, w_p, b_p, a_src, a_dst)

    # new_emb residency decision: double-buffered bf16 slab must fit a 24 MiB
    # budget (leaves headroom vs the 48 MiB scoped VMEM cap, v7x-safe).
    emb_resident = (2 * Np * Dp * 2) <= 24 * 1024 * 1024

    if emb_resident:
        # Constant index map => fetched once, reused across the whole grid.
        emb_spec = pl.BlockSpec((Np, Dp), lambda i, j, cb, nz: (0, 0))
    else:
        # Streamed per nonzero column block (DMA skipped for empty blocks).
        emb_spec = pl.BlockSpec(
            (tn, Dp), lambda i, j, cb, nz: (cb[i * max_nnz + j], 0))

    # Phase 2: tiled score / aggregation with resident f32 accumulators.
    kernel = functools.partial(aggregate_kernel, slope_ratio=slope_ratio,
                               max_nnz=max_nnz, tn=tn,
                               emb_resident=emb_resident)
    out_p = pl.pallas_call(
        kernel,
        out_shape=jax.ShapeDtypeStruct((Np, Dp), f32),
        grid_spec=pltpu.PrefetchScalarGridSpec(
            num_scalar_prefetch=2,
            grid=(n_rt, max_nnz),
            in_specs=[
                pl.BlockSpec((tm, 1), lambda i, j, cb, nz: (i, 0)),     # s_src
                pl.BlockSpec((1, tn),                                   # s_dst
                             lambda i, j, cb, nz: (0, cb[i * max_nnz + j])),
                pl.BlockSpec((tm, tn),                                  # adj i8
                             lambda i, j, cb, nz: (i, cb[i * max_nnz + j])),
                emb_spec,                                               # new_emb
            ],
            out_specs=pl.BlockSpec((tm, Dp), lambda i, j, cb, nz: (i, 0)),
            scratch_shapes=[pltpu.VMEM((tm, Dp), jnp.float32),
                            pltpu.VMEM((tm, 1), jnp.float32)],
        ),
        compiler_params=pltpu.CompilerParams(
            dimension_semantics=("parallel", "arbitrary"),
            vmem_limit_bytes=48 * 1024 * 1024),
    )(cols, nnz, s_src, s_dst, adj, emb)

    return out_p[:N, :out_dim]


def _reference(x, edge_index, w_t, b, a, slope_ratio=0.1):
    """Pure-JAX reference mirroring the PyTorch forward exactly (all f32)."""
    new_emb = x @ w_t + b
    h_src = new_emb[edge_index[0]]
    h_dst = new_emb[edge_index[1]]
    edge_h2 = jnp.concatenate([h_src, h_dst], axis=1)        # (E, 2*out_dim)
    logits = edge_h2 @ a                                     # (E, 1)
    lrelu = jnp.where(logits >= 0, logits, slope_ratio * logits)
    e = jnp.exp(lrelu)[:, 0]                                 # (E,)
    N = x.shape[0]
    row_sum = jnp.zeros((N, 1)).at[edge_index[0], 0].add(e)
    results = jnp.zeros((N, new_emb.shape[1])).at[edge_index[0]].add(
        e[:, None] * h_dst)
    return results / (row_sum + 1e-12)


if __name__ == "__main__":
    key = jax.random.PRNGKey(0)
    N, in_dim, out_dim, E = 16, 8, 16, 40

    k_x, k_w, k_b, k_a, k_src, k_dst = jax.random.split(key, 6)

    x = jax.random.normal(k_x, (N, in_dim), dtype=jnp.float32)

    # Deterministic parameter init (shapes from the module's __init__).
    bound = 1.0 / jnp.sqrt(jnp.float32(in_dim))
    w = jax.random.uniform(k_w, (out_dim, in_dim), jnp.float32, -bound, bound)
    b = jax.random.uniform(k_b, (out_dim,), jnp.float32, -bound, bound)
    w_t = w.T                                              # (in_dim, out_dim)
    # kaiming_normal_ on (2*out_dim, 1): std = sqrt(2 / fan_in), fan_in = 1
    a = jax.random.normal(k_a, (2 * out_dim, 1), jnp.float32) * jnp.sqrt(2.0)

    src = jax.random.randint(k_src, (E,), 0, N, dtype=jnp.int32)
    dst = jax.random.randint(k_dst, (E,), 0, N, dtype=jnp.int32)
    edge_index = jnp.stack([src, dst], axis=0)             # (2, E)

    out = attention_aggregator(x, edge_index, w_t, b, a, slope_ratio=0.1)
    out = jax.block_until_ready(out)

    ref = _reference(x, edge_index, w_t, b, a, slope_ratio=0.1)
    assert out.shape == (N, out_dim)
    # Tolerance accounts for bf16 MXU operands (scores/emb) and the EUP
    # approximate reciprocal vs the all-f32 reference.
    assert jnp.allclose(out, ref, atol=2e-2, rtol=2e-2), "mismatch vs reference"

    print("KERNEL_OK")
</pallas_src>

<mosaic_0001>
module attributes {stable_mosaic.version = 11 : i64} {
  func.func @prelude_kernel(%arg0: i32, %arg1: memref<128x8xf32, #tpu.memory_space<vmem>>, %arg2: memref<8x128xf32, #tpu.memory_space<vmem>>, %arg3: memref<1x128xf32, #tpu.memory_space<vmem>>, %arg4: memref<1x128xf32, #tpu.memory_space<vmem>>, %arg5: memref<1x128xf32, #tpu.memory_space<vmem>>, %arg6: memref<128x128xbf16, #tpu.memory_space<vmem>>, %arg7: memref<128x1xf32, #tpu.memory_space<vmem>>, %arg8: memref<1x128xf32, #tpu.memory_space<vmem>>) attributes {dimension_semantics = [#tpu.dimension_semantics<parallel>], iteration_bounds = array<i64: 1>, scalar_prefetch = 0 : i64, scratch_operands = 0 : i64, tpu.core_type = #tpu.core_type<tc>, window_params = [{transform_indices = @transform_0, window_bounds = array<i64: 128, 8>}, {pipeline_mode = #tpu.pipeline_mode<synchronous>, transform_indices = @transform_1, window_bounds = array<i64: 8, 128>}, {pipeline_mode = #tpu.pipeline_mode<synchronous>, transform_indices = @transform_2, window_bounds = array<i64: 1, 128>}, {pipeline_mode = #tpu.pipeline_mode<synchronous>, transform_indices = @transform_3, window_bounds = array<i64: 1, 128>}, {pipeline_mode = #tpu.pipeline_mode<synchronous>, transform_indices = @transform_4, window_bounds = array<i64: 1, 128>}, {transform_indices = @transform_5, window_bounds = array<i64: 128, 128>}, {transform_indices = @transform_6, window_bounds = array<i64: 128, 1>}, {transform_indices = @transform_7, window_bounds = array<i64: 1, 128>}]} {
    %c0 = arith.constant 0 : index
    %c0_0 = arith.constant 0 : index
    %0 = vector.load %arg1[%c0, %c0_0] : memref<128x8xf32, #tpu.memory_space<vmem>>, vector<128x8xf32>
    %c0_1 = arith.constant 0 : index
    %c0_2 = arith.constant 0 : index
    %1 = vector.load %arg2[%c0_1, %c0_2] : memref<8x128xf32, #tpu.memory_space<vmem>>, vector<8x128xf32>
    %cst = arith.constant dense<0.000000e+00> : vector<128x128xf32>
    %2 = tpu.matmul %0, %1, %cst {dimension_numbers = #tpu.dot_dimension_numbers<[1], [0], [0], [1], [0, 0, 1, 1], [], []>} : vector<128x8xf32>, vector<8x128xf32>, vector<128x128xf32> -> vector<128x128xf32>
    %c0_3 = arith.constant 0 : index
    %c0_4 = arith.constant 0 : index
    %3 = vector.load %arg3[%c0_3, %c0_4] : memref<1x128xf32, #tpu.memory_space<vmem>>, vector<1x128xf32>
    %4 = vector.broadcast %3 : vector<1x128xf32> to vector<128x128xf32>
    %5 = arith.addf %2, %4 : vector<128x128xf32>
    %6 = arith.truncf %5 : vector<128x128xf32> to vector<128x128xbf16>
    %c0_5 = arith.constant 0 : index
    %c0_6 = arith.constant 0 : index
    %7 = vector.load %arg6[%c0_5, %c0_6] : memref<128x128xbf16, #tpu.memory_space<vmem>>, vector<128x128xbf16>
    tpu.vector_store %arg6[%c0_5, %c0_6], %6 {strides = array<i32>} : memref<128x128xbf16, #tpu.memory_space<vmem>>, vector<128x128xbf16>,
    %c0_7 = arith.constant 0 : index
    %c0_8 = arith.constant 0 : index
    %8 = vector.load %arg4[%c0_7, %c0_8] : memref<1x128xf32, #tpu.memory_space<vmem>>, vector<1x128xf32>
    %9 = vector.broadcast %8 : vector<1x128xf32> to vector<128x128xf32>
    %10 = arith.mulf %5, %9 : vector<128x128xf32>
    %cst_9 = arith.constant dense<0.000000e+00> : vector<128xf32>
    %11 = vector.multi_reduction <add>, %10, %cst_9 [1] : vector<128x128xf32> to vector<128xf32>
    %12 = vector.shape_cast %11 : vector<128xf32> to vector<128x1xf32>
    %c0_10 = arith.constant 0 : index
    %c0_11 = arith.constant 0 : index
    %13 = vector.load %arg7[%c0_10, %c0_11] : memref<128x1xf32, #tpu.memory_space<vmem>>, vector<128x1xf32>
    tpu.vector_store %arg7[%c0_10, %c0_11], %12 {strides = array<i32>} : memref<128x1xf32, #tpu.memory_space<vmem>>, vector<128x1xf32>,
    %c0_12 = arith.constant 0 : index
    %c0_13 = arith.constant 0 : index
    %14 = vector.load %arg5[%c0_12, %c0_13] : memref<1x128xf32, #tpu.memory_space<vmem>>, vector<1x128xf32>
    %cst_14 = arith.constant dense<0.000000e+00> : vector<1x128xf32>
    %15 = tpu.matmul %14, %5, %cst_14 {dimension_numbers = #tpu.dot_dimension_numbers<[1], [1], [0], [0], [0, 0, 1, 0], [], []>} : vector<1x128xf32>, vector<128x128xf32>, vector<1x128xf32> -> vector<1x128xf32>
    %c0_15 = arith.constant 0 : index
    %c0_16 = arith.constant 0 : index
    %16 = vector.load %arg8[%c0_15, %c0_16] : memref<1x128xf32, #tpu.memory_space<vmem>>, vector<1x128xf32>
    tpu.vector_store %arg8[%c0_15, %c0_16], %15 {strides = array<i32>} : memref<1x128xf32, #tpu.memory_space<vmem>>, vector<1x128xf32>,
    return
  }
  func.func @transform_0(%arg0: i32) -> (i32, i32) {
    %c0_i32 = arith.constant 0 : i32
    %c0_i32_0 = arith.constant 0 : i32
    return %arg0, %c0_i32 : i32, i32
  }
  func.func @transform_1(%arg0: i32) -> (i32, i32) {
    %c0_i32 = arith.constant 0 : i32
    %c0_i32_0 = arith.constant 0 : i32
    %c0_i32_1 = arith.constant 0 : i32
    return %c0_i32, %c0_i32_0 : i32, i32
  }
  func.func @transform_2(%arg0: i32) -> (i32, i32) {
    %c0_i32 = arith.constant 0 : i32
    %c0_i32_0 = arith.constant 0 : i32
    %c0_i32_1 = arith.constant 0 : i32
    return %c0_i32, %c0_i32_0 : i32, i32
  }
  func.func @transform_3(%arg0: i32) -> (i32, i32) {
    %c0_i32 = arith.constant 0 : i32
    %c0_i32_0 = arith.constant 0 : i32
    %c0_i32_1 = arith.constant 0 : i32
    return %c0_i32, %c0_i32_0 : i32, i32
  }
  func.func @transform_4(%arg0: i32) -> (i32, i32) {
    %c0_i32 = arith.constant 0 : i32
    %c0_i32_0 = arith.constant 0 : i32
    %c0_i32_1 = arith.constant 0 : i32
    return %c0_i32, %c0_i32_0 : i32, i32
  }
  func.func @transform_5(%arg0: i32) -> (i32, i32) {
    %c0_i32 = arith.constant 0 : i32
    %c0_i32_0 = arith.constant 0 : i32
    return %arg0, %c0_i32 : i32, i32
  }
  func.func @transform_6(%arg0: i32) -> (i32, i32) {
    %c0_i32 = arith.constant 0 : i32
    %c0_i32_0 = arith.constant 0 : i32
    return %arg0, %c0_i32 : i32, i32
  }
  func.func @transform_7(%arg0: i32) -> (i32, i32) {
    %c0_i32 = arith.constant 0 : i32
    %c0_i32_0 = arith.constant 0 : i32
    return %c0_i32, %arg0 : i32, i32
  }
}

</mosaic_0001>

<bundles_post_ra>
// kernel: tpu_custom_call.1
= control target key start
LH: loop header
LB: loop body
LE: loop exit
PB: predicated region body
PF: predicated region fallthrough
CT: control target
= control target key end

     0   :  { %13 = vsyncpa [#allocation3], 0  ;;  %vm46_vm0 = vcmask 64512   ;;  %s695_s0 = inlined_call_operand.vmem [shape: f32[128,8], index: 0, kind: input, shape index: {}]   ;;  %s696_s1 = inlined_call_operand.vmem [shape: f32[8,128], index: 1, kind: input, shape index: {}]   ;;  %s697_s2 = inlined_call_operand.vmem [shape: f32[1,128], index: 2, kind: input, shape index: {}]   ;;  %s698_s3 = inlined_call_operand.vmem [shape: f32[1,128], index: 3, kind: input, shape index: {}]   ;;  %s699_s4 = inlined_call_operand.vmem [shape: f32[1,128], index: 4, kind: input, shape index: {}]   ;;  %s700_s5 = inlined_call_operand.hbm [shape: bf16[128,128], index: 5, kind: output, shape index: {0}]   ;;  %s701_s6 = inlined_call_operand.vmem [shape: f32[128,1], index: 6, kind: output, shape index: {1}]   ;;  %s702_s7 = inlined_call_operand.hbm [shape: f32[1,128], index: 7, kind: output, shape index: {2}]  }
   0x1   :  { %v41_v0 = vld [vmem:[%s696_s1] sm:$0xff]  ;;  %v32_v2 = vld [vmem:[%s695_s0 + $0x38] sm:$0xff]  ;;  %v39_v3 = vld [vmem:[%s695_s0 + $0x70] sm:$0xff] }
   0x2   :  { %v25_v1 = vld [vmem:[%s695_s0] sm:$0xff]  ;;  %110 = vmatpush.msra.mxu0 %v41_v0  ;;  %384 = vmatpush.msra.mxu2 %v41_v0 }
   0x3   :  { %321 = vmatmul.msk.f32.vlgmr.msra.gmra.mxu0 %vm46_vm0, %v25_v1  ;;  %328 = vmatmul.msk.f32.vlgmr.msra.gmra.mxu2 %vm46_vm0, %v32_v2 }
   0x4   :  { %385 = vmatpush.msra.mxu3 %v41_v0 }
   0x5   :  { %335 = vmatmul.msk.f32.vlgmr.msra.gmra.mxu3 %vm46_vm0, %v39_v3 }
   0x6   :  { %14 = vsyncpa [#allocation5], 0  ;;  %v26_v4 = vld [vmem:[%s695_s0 + $0x8] sm:$0xff]  ;;  %v33_v5 = vld [vmem:[%s695_s0 + $0x40] sm:$0xff]  ;;  %s289_s17 = sshll.u32 %s700_s5, 4  ;;  %s445_s18 = smov 64   ;;  %s290_s17 = int_to_ptr.hbm [resolvable:$true] %s289_s17 }
   0x7   :  { %v40_v6 = vld [vmem:[%s695_s0 + $0x78] sm:$0xff]  ;;  %v27_v7 = vld [vmem:[%s695_s0 + $0x10] sm:$0xff]  ;;  %v34_v8 = vld [vmem:[%s695_s0 + $0x48] sm:$0xff]  ;;  %s446_s19 = smov 4   ;;  %vm244_vm1 = vcmask 7168   ;;  %s447_s22 = smov [#allocation4]  }
   0x8   :  { %v28_v9 = vld [vmem:[%s695_s0 + $0x18] sm:$0xff]  ;;  %v35_v10 = vld [vmem:[%s695_s0 + $0x50] sm:$0xff]  ;;  %v29_v11 = vld [vmem:[%s695_s0 + $0x20] sm:$0xff]  ;;  %s303_s5 = sshll.u32 %s447_s22, 4  ;;  %s305_s25 = sshll.u32 %s702_s7, 4  ;;  %s304_s5 = int_to_ptr.vmem [resolvable:$true] %s303_s5  ;;  %s306_s25 = int_to_ptr.hbm [resolvable:$true] %s305_s25 }
   0x9   :  { %v36_v12 = vld [vmem:[%s695_s0 + $0x58] sm:$0xff]  ;;  %v30_v13 = vld [vmem:[%s695_s0 + $0x28] sm:$0xff]  ;;  %v37_v14 = vld [vmem:[%s695_s0 + $0x60] sm:$0xff] }
   0xa   :  { %v31_v15 = vld [vmem:[%s695_s0 + $0x30] sm:$0xff]  ;;  %v38_v16 = vld [vmem:[%s695_s0 + $0x68] sm:$0xff]  ;;  %v558_v17 = vld [vmem:[%s697_s2] ss:$0 sm:$0xff] }
   0xb   :  { %322 = vmatmul.msk.f32.gmra.mxu0 %vm46_vm0, %v26_v4  ;;  %329 = vmatmul.msk.f32.gmra.mxu2 %vm46_vm0, %v33_v5  ;;  %v563_v18 = vld [vmem:[%s698_s3] ss:$0 sm:$0xff]  ;;  %s444_s3 = smov [#allocation2]  }
   0xc   :  { %s287_s14 = sshll.u32 %s444_s3, 4  ;;  %s288_s14 = int_to_ptr.vmem [resolvable:$true] %s287_s14 }
   0xd   :  { %336 = vmatmul.msk.f32.gmra.mxu3 %vm46_vm0, %v40_v6 }
  0x13   :  { %323 = vmatmul.msk.f32.gmra.mxu0 %vm46_vm0, %v27_v7  ;;  %330 = vmatmul.msk.f32.gmra.mxu2 %vm46_vm0, %v34_v8 }
  0x1b   :  { %324 = vmatmul.msk.f32.gmra.mxu0 %vm46_vm0, %v28_v9  ;;  %331 = vmatmul.msk.f32.gmra.mxu2 %vm46_vm0, %v35_v10 }
  0x23   :  { %325 = vmatmul.msk.f32.gmra.mxu0 %vm46_vm0, %v29_v11  ;;  %332 = vmatmul.msk.f32.gmra.mxu2 %vm46_vm0, %v36_v12  ;;  %v261_v11 = vld [vmem:[%s699_s4] sm:$0x1] }
  0x2b   :  { %326 = vmatmul.msk.f32.gmra.mxu0 %vm46_vm0, %v30_v13  ;;  %333 = vmatmul.msk.f32.gmra.mxu2 %vm46_vm0, %v37_v14 }
  0x33   :  { %327 = vmatmul.msk.f32.gmra.mxu0 %vm46_vm0, %v31_v15  ;;  %334 = vmatmul.msk.f32.gmra.mxu2 %vm46_vm0, %v38_v16 }
  0x80   :  { %v112_v19 = vpop.f32.mrf.mxu0 }
  0x81   :  { %v566_v20 = vadd.f32 %v558_v17, %v112_v19 }
  0x83   :  { %v196_v21 = vmul.f32 %v563_v18, %v566_v20 }
  0x85   :  { %212 = vadd.xlane.f32.xlu0 %v196_v21 }
  0x86   :  { %v133_v22 = vpop.f32.mrf.mxu2 }
  0x87   :  { %v571_v23 = vadd.f32 %v558_v17, %v133_v22 }
  0x88   :  { %v115_v24 = vpop.f32.mrf.mxu0  ;;  %v154_v25 = vpop.f32.mrf.mxu3 }
  0x89   :  { %v574_v26 = vadd.f32 %v558_v17, %v115_v24  ;;  %v203_v27 = vmul.f32 %v563_v18, %v571_v23  ;;  %v155_v32 = vadd.f32 %v558_v17, %v154_v25 }
  0x8b   :  { %v340_v28 = vpack.c.bf16 %v574_v26, %v566_v20  ;;  %226 = vadd.xlane.f32.xlu1 %v203_v27  ;;  %v197_v29 = vmul.f32 %v563_v18, %v574_v26  ;;  %v210_v9 = vmul.f32 %v563_v18, %v155_v32 }
  0x8d   :  { %341 = vst [vmem:[#allocation2] sm:$0xff] %v340_v28   ;;  %214 = vadd.xlane.f32.xlu0 %v197_v29 }
  0x8e   :  { %v136_v30 = vpop.f32.mrf.mxu2 }
  0x8f   :  { %v583_v31 = vadd.f32 %v558_v17, %v136_v30 }
  0x90   :  { %v118_v33 = vpop.f32.mrf.mxu0  ;;  %v157_v34 = vpop.f32.mrf.mxu3 }
  0x91   :  { %v587_v35 = vadd.f32 %v558_v17, %v118_v33  ;;  %v204_v36 = vmul.f32 %v563_v18, %v583_v31  ;;  %v158_v37 = vadd.f32 %v558_v17, %v157_v34 }
  0x93   :  { %228 = vadd.xlane.f32.xlu2 %v204_v36  ;;  %v198_v38 = vmul.f32 %v563_v18, %v587_v35  ;;  %v375_v39 = vpack.c.bf16 %v158_v37, %v155_v32  ;;  %262 = vmatpush.xpose.msra.mxu1 %v158_v37  ;;  %v211_v10 = vmul.f32 %v563_v18, %v158_v37 }
  0x95   :  { %216 = vadd.xlane.f32.xlu1 %v198_v38  ;;  %383 = vst [vmem:[#allocation2 + $0x38] sm:$0xff] %v375_v39  }
  0x96   :  { %v139_v40 = vpop.f32.mrf.mxu2 }
  0x97   :  { %v140_v41 = vadd.f32 %v558_v17, %v139_v40  ;;  %263 = vmatpush.xpose.msra.mxu1 %v155_v32 }
  0x98   :  { %v121_v42 = vpop.f32.mrf.mxu0 }
  0x99   :  { %v360_v43 = vpack.c.bf16 %v140_v41, %v583_v31  ;;  %v122_v44 = vadd.f32 %v558_v17, %v121_v42  ;;  %v205_v45 = vmul.f32 %v563_v18, %v140_v41 }
  0x9b   :  { %380 = vst [vmem:[#allocation2 + $0x20] sm:$0xff] %v360_v43   ;;  %v345_v46 = vpack.c.bf16 %v122_v44, %v587_v35  ;;  %230 = vadd.xlane.f32.xlu0 %v205_v45  ;;  %v199_v47 = vmul.f32 %v563_v18, %v122_v44 }
  0x9d   :  { %377 = vst [vmem:[#allocation2 + $0x8] sm:$0xff] %v345_v46   ;;  %218 = vadd.xlane.f32.xlu1 %v199_v47 }
  0x9e   :  { %v142_v48 = vpop.f32.mrf.mxu2 }
  0x9f   :  { %v143_v49 = vadd.f32 %v558_v17, %v142_v48 }
  0xa0   :  { %v124_v50 = vpop.f32.mrf.mxu0 }
  0xa1   :  { %v125_v51 = vadd.f32 %v558_v17, %v124_v50  ;;  %v206_v53 = vmul.f32 %v563_v18, %v143_v49 }
  0xa3   :  { %v200_v52 = vmul.f32 %v563_v18, %v125_v51 }
  0xa5   :  { %220 = vadd.xlane.f32.xlu2 %v200_v52  ;;  %232 = vadd.xlane.f32.xlu1 %v206_v53 }
  0xa6   :  { %v145_v54 = vpop.f32.mrf.mxu2 }
  0xa7   :  { %v146_v55 = vadd.f32 %v558_v17, %v145_v54 }
  0xa8   :  { %v127_v56 = vpop.f32.mrf.mxu0 }
  0xa9   :  { %v365_v57 = vpack.c.bf16 %v146_v55, %v143_v49  ;;  %v128_v58 = vadd.f32 %v558_v17, %v127_v56  ;;  %v207_v60 = vmul.f32 %v563_v18, %v146_v55 }
  0xab   :  { %381 = vst [vmem:[#allocation2 + $0x28] sm:$0xff] %v365_v57   ;;  %v350_v59 = vpack.c.bf16 %v128_v58, %v125_v51  ;;  %v201_v2 = vmul.f32 %v563_v18, %v128_v58 }
  0xad   :  { %378 = vst [vmem:[#allocation2 + $0x10] sm:$0xff] %v350_v59   ;;  %234 = vadd.xlane.f32.xlu2 %v207_v60 }
  0xae   :  { %v148_v61 = vpop.f32.mrf.mxu2 }
  0xaf   :  { %v149_v62 = vadd.f32 %v558_v17, %v148_v61 }
  0xb0   :  { %v130_v63 = vpop.f32.mrf.mxu0 }
  0xb1   :  { %v131_v0 = vadd.f32 %v558_v17, %v130_v63  ;;  %v208_v1 = vmul.f32 %v563_v18, %v149_v62 }
  0xb3   :  { %v355_v3 = vpack.c.bf16 %v571_v23, %v131_v0  ;;  %236 = vadd.xlane.f32.xlu0 %v208_v1  ;;  %v202_v6 = vmul.f32 %v563_v18, %v131_v0 }
  0xb5   :  { %379 = vst [vmem:[#allocation2 + $0x18] sm:$0xff] %v355_v3   ;;  %222 = vadd.xlane.f32.xlu2 %v201_v2 }
  0xb6   :  { %v151_v4 = vpop.f32.mrf.mxu2 }
  0xb7   :  { %v152_v5 = vadd.f32 %v558_v17, %v151_v4 }
  0xb9   :  { %v370_v7 = vpack.c.bf16 %v152_v5, %v149_v62  ;;  %264 = vmatpush.xpose.msra.mxu1 %v152_v5  ;;  %v209_v8 = vmul.f32 %v563_v18, %v152_v5 }
  0xbb   :  { %382 = vst [vmem:[#allocation2 + $0x30] sm:$0xff] %v370_v7   ;;  %238 = vadd.xlane.f32.xlu1 %v209_v8  ;;  %224 = vadd.xlane.f32.xlu0 %v202_v6 }
  0xbc   :  { %295 = dma.vmem_to_hbm [thread:$0]  %s288_s14, 1024, %s290_s17, [#allocation3], %s445_s18, %s445_s18, %s446_s19  }
  0xbd   :  { %265 = vmatpush.xpose.msra.mxu1 %v149_v62  ;;  %240 = vadd.xlane.f32.xlu2 %v210_v9 }
  0xc1   :  { %266 = vmatpush.xpose.msra.mxu1 %v146_v55 }
  0xc3   :  { %242 = vadd.xlane.f32.xlu0 %v211_v10 }
  0xc5   :  { %267 = vmatpush.xpose.msra.mxu1 %v143_v49 }
  0xc9   :  { %268 = vmatpush.xpose.msra.mxu1 %v140_v41 }
  0xcd   :  { %269 = vmatpush.xpose.msra.mxu1 %v583_v31 }
  0xd1   :  { %270 = vmatpush.xpose.msra.mxu1 %v571_v23 }
  0xd5   :  { %271 = vmatpush.xpose.msra.mxu1 %v131_v0 }
  0xd9   :  { %272 = vmatpush.xpose.msra.mxu1 %v128_v58 }
  0xdd   :  { %273 = vmatpush.xpose.msra.mxu1 %v125_v51 }
  0xe1   :  { %274 = vmatpush.xpose.msra.mxu1 %v122_v44 }
  0xe5   :  { %275 = vmatpush.xpose.msra.mxu1 %v587_v35 }
  0xe9   :  { %276 = vmatpush.xpose.msra.mxu1 %v574_v26 }
  0xed   :  { %277 = vmatpush.xpose.msra.mxu1 %v566_v20 }
  0xf0   :  { %278 = vmatmul.f32.vlgmr.msra.gmra.mxu1 %v261_v11 }
  0xf8   :  { %v213_v12 = vpop.xlane.xlu0 %212 }
  0xf9   :  { %245 = vst.msk [vmem:[%s701_s6] sm:$0xff] %vm244_vm1, %v213_v12 }
  0xfe   :  { %v227_v13 = vpop.xlane.xlu1 %226 }
  0xff   :  { %252 = vst.msk [vmem:[%s701_s6 + $0x38] sm:$0xff] %vm244_vm1, %v227_v13 }
 0x100   :  { %v215_v14 = vpop.xlane.xlu0 %214 }
 0x101   :  { %246 = vst.msk [vmem:[%s701_s6 + $0x8] sm:$0xff] %vm244_vm1, %v215_v14 }
 0x106   :  { %v229_v15 = vpop.xlane.xlu2 %228 }
 0x107   :  { %253 = vst.msk [vmem:[%s701_s6 + $0x40] sm:$0xff] %vm244_vm1, %v229_v15 }
 0x108   :  { %v217_v16 = vpop.xlane.xlu1 %216 }
 0x109   :  { %247 = vst.msk [vmem:[%s701_s6 + $0x10] sm:$0xff] %vm244_vm1, %v217_v16 }
 0x10e   :  { %v231_v17 = vpop.xlane.xlu0 %230 }
 0x10f   :  { %254 = vst.msk [vmem:[%s701_s6 + $0x48] sm:$0xff] %vm244_vm1, %v231_v17 }
 0x110   :  { %v219_v18 = vpop.xlane.xlu1 %218 }
 0x111   :  { %248 = vst.msk [vmem:[%s701_s6 + $0x18] sm:$0xff] %vm244_vm1, %v219_v18 }
 0x118   :  { %v221_v19 = vpop.xlane.xlu2 %220  ;;  %v233_v20 = vpop.xlane.xlu1 %232 }
 0x119   :  { %249 = vst.msk [vmem:[%s701_s6 + $0x20] sm:$0xff] %vm244_vm1, %v221_v19 }
 0x11a   :  { %255 = vst.msk [vmem:[%s701_s6 + $0x50] sm:$0xff] %vm244_vm1, %v233_v20 }
 0x120   :  { %v235_v21 = vpop.xlane.xlu2 %234 }
 0x121   :  { %256 = vst.msk [vmem:[%s701_s6 + $0x58] sm:$0xff] %vm244_vm1, %v235_v21 }
 0x126   :  { %v237_v22 = vpop.xlane.xlu0 %236 }
 0x127   :  { %257 = vst.msk [vmem:[%s701_s6 + $0x60] sm:$0xff] %vm244_vm1, %v237_v22 }
 0x128   :  { %v223_v23 = vpop.xlane.xlu2 %222 }
 0x129   :  { %250 = vst.msk [vmem:[%s701_s6 + $0x28] sm:$0xff] %vm244_vm1, %v223_v23 }
 0x12e   :  { %v239_v24 = vpop.xlane.xlu1 %238  ;;  %v225_v25 = vpop.xlane.xlu0 %224 }
 0x12f   :  { %258 = vst.msk [vmem:[%s701_s6 + $0x68] sm:$0xff] %vm244_vm1, %v239_v24 }
 0x130   :  { %251 = vst.msk [vmem:[%s701_s6 + $0x30] sm:$0xff] %vm244_vm1, %v225_v25  ;;  %v241_v26 = vpop.xlane.xlu2 %240 }
 0x131   :  { %259 = vst.msk [vmem:[%s701_s6 + $0x70] sm:$0xff] %vm244_vm1, %v241_v26 }
 0x136   :  { %v243_v27 = vpop.xlane.xlu0 %242 }
 0x137   :  { %260 = vst.msk [vmem:[%s701_s6 + $0x78] sm:$0xff] %vm244_vm1, %v243_v27 }
 0x16d   :  { %v279_v28 = vpop.f32.mrf.mxu1 }
 0x16e   :  { %282 = vst [vmem:[#allocation4] sm:$0x1] %v279_v28 }
 0x16f   :  { %308 = dma.vmem_to_hbm [thread:$0]  %s304_s5, 16, %s306_s25, [#allocation5]  }
 0x170   :  { %440 = dma.done.wait [#allocation3], 1024  }
 0x171   :  { %441 = vsyncadd [#allocation3], 4294966272 }
 0x172   :  { %442 = dma.done.wait [#allocation5], 16  }
 0x173   :  { %443 = vsyncadd [#allocation5], 4294967280 }
 0x174   :  { %319 = vsyncpa [#allocation3], 1 }
 0x175   :  { %320 = vsyncpa [#allocation5], 1 }

</bundles_post_ra>
